<compile_context>
chip_gen: v6e
topology: v6e:2x2x1
jax: 0.10.0
libtpu: 0.0.40
codegen_flags: <defaults>
</compile_context>

<pallas_src>
import jax
import jax.numpy as jnp
from jax import lax
from jax.experimental import pallas as pl
from jax.experimental.pallas import tpu as pltpu


def conv_gru_cell(x_nchw, h_nchw, params):
    """Pallas ConvGRUCell forward. x: (B, Cin, H, W), h: (B, Cout, H, W) NCHW."""
    B, Cin, H, W = x_nchw.shape
    Cout = h_nchw.shape[1]
    HW = H * W

    # Free reshapes (metadata only): NCHW -> (B, C, H*W).
    x = x_nchw.reshape(B, Cin, HW).astype(jnp.float32)
    h = h_nchw.reshape(B, Cout, HW).astype(jnp.float32)

    # --- weight prep (wrapper side, tiny one-off XLA ops) -------------------
    # OIHW conv weights; input-channel order in the cat is [state(Cout), x(Cin)].
    def to2d(w):
        # (O, I, 3, 3) -> (O, 9*I) with K ordered as (ky, kx, i), matching the
        # in-kernel im2col row order.
        O, I = w.shape[0], w.shape[1]
        return jnp.transpose(w, (0, 2, 3, 1)).reshape(O, 9 * I)

    wr, wu, ws = params["wr"], params["wu"], params["ws"]
    wr_h, wr_x = wr[:, :Cout], wr[:, Cout:]
    wu_h, wu_x = wu[:, :Cout], wu[:, Cout:]
    ws_h, ws_x = ws[:, :Cout], ws[:, Cout:]

    # x-path conv producing [r_x; u_x; s_x] (x is shared by cat1 and cat2).
    wx2d = to2d(jnp.concatenate([wr_x, wu_x, ws_x], axis=0)).astype(jnp.float32)    # (3*Cout, 9*Cin)
    # h-path conv producing [r_h; u_h].
    whru2d = to2d(jnp.concatenate([wr_h, wu_h], axis=0)).astype(jnp.float32)        # (2*Cout, 9*Cout)
    # (r*h)-path conv producing s_h.
    whs2d = to2d(ws_h).astype(jnp.float32)                                          # (Cout, 9*Cout)
    # All biases packed as one column vector [br; bu; bs].
    bias = jnp.concatenate([params["br"], params["bu"], params["bs"]]
                           ).reshape(3 * Cout, 1).astype(jnp.float32)               # (3*Cout, 1)

    # --- kernel -------------------------------------------------------------
    def kernel(x_ref, h_ref, wx_ref, whru_ref, whs_ref, b_ref, out_ref):
        f32 = jnp.float32
        xv = x_ref[0]   # (Cin, HW)
        hv = h_ref[0]   # (Cout, HW)

        # Column masks: horizontal taps (dx = +/-1) wrap across image rows in
        # the flattened layout; zero those columns.
        col = lax.broadcasted_iota(jnp.int32, (1, HW), 1) % W
        mask_l = (col >= 1).astype(f32)        # valid for dx = -1
        mask_r = (col <= W - 2).astype(f32)    # valid for dx = +1

        def im2col(img):
            # img: (C, HW) -> (9*C, HW); rows grouped by 3x3 tap (ky, kx),
            # each block of C rows in input-channel order (matches to2d()).
            C = img.shape[0]
            P = W + 1
            padded = jnp.pad(img, ((0, 0), (P, P)))   # lane-axis zero pad
            taps = []
            for dy in (-1, 0, 1):
                for dx in (-1, 0, 1):
                    off = P + dy * W + dx             # static lane-window slice
                    t = padded[:, off:off + HW]
                    if dx == -1:
                        t = t * mask_l
                    elif dx == 1:
                        t = t * mask_r
                    taps.append(t)
            return jnp.concatenate(taps, axis=0)

        px = im2col(xv)   # (9*Cin,  HW)
        ph = im2col(hv)   # (9*Cout, HW)

        # x contributions to all three convs (one matmul), h contributions to r/u.
        gx = jnp.dot(wx_ref[...], px, preferred_element_type=f32)    # (3*Cout, HW)
        gh = jnp.dot(whru_ref[...], ph, preferred_element_type=f32)  # (2*Cout, HW)
        b = b_ref[...]                                               # (3*Cout, 1)

        r = jax.nn.sigmoid(gx[0:Cout] + gh[0:Cout] + b[0:Cout])
        u = jax.nn.sigmoid(gx[Cout:2 * Cout] + gh[Cout:2 * Cout] + b[Cout:2 * Cout])

        prh = im2col(r * hv)                                         # (9*Cout, HW)
        cand = jnp.tanh(gx[2 * Cout:3 * Cout]
                        + jnp.dot(whs_ref[...], prh, preferred_element_type=f32)
                        + b[2 * Cout:3 * Cout])

        out_ref[0] = ((1.0 - u) * hv + u * cand).astype(out_ref.dtype)

    # TODO(synk): for much larger H*W or C, tile spatially (rows with a 1-row
    # halo) and set vmem_limit_bytes so the working set fits v7x's 64 MiB VMEM.
    out_flat = pl.pallas_call(
        kernel,
        out_shape=jax.ShapeDtypeStruct((B, Cout, HW), jnp.float32),
        grid_spec=pltpu.PrefetchScalarGridSpec(
            num_scalar_prefetch=0,
            grid=(B,),
            in_specs=[
                pl.BlockSpec((1, Cin, HW), lambda b: (b, 0, 0)),
                pl.BlockSpec((1, Cout, HW), lambda b: (b, 0, 0)),
                pl.BlockSpec((3 * Cout, 9 * Cin), lambda b: (0, 0)),
                pl.BlockSpec((2 * Cout, 9 * Cout), lambda b: (0, 0)),
                pl.BlockSpec((Cout, 9 * Cout), lambda b: (0, 0)),
                pl.BlockSpec((3 * Cout, 1), lambda b: (0, 0)),
            ],
            out_specs=pl.BlockSpec((1, Cout, HW), lambda b: (b, 0, 0)),
        ),
        compiler_params=pltpu.CompilerParams(
            dimension_semantics=("parallel",)),
    )(x, h, wx2d, whru2d, whs2d, bias)

    # Free reshape back to NCHW.
    return out_flat.reshape(B, Cout, H, W)


def conv_gru_cell_ref(x, h, params):
    """Plain-JAX reference (NCHW, OIHW) mirroring the PyTorch module."""
    def conv(inp, w, b):
        y = lax.conv_general_dilated(
            inp, w, window_strides=(1, 1), padding="SAME",
            dimension_numbers=("NCHW", "OIHW", "NCHW"))
        return y + b[None, :, None, None]

    cat1 = jnp.concatenate([h, x], axis=1)
    r = jax.nn.sigmoid(conv(cat1, params["wr"], params["br"]))
    u = jax.nn.sigmoid(conv(cat1, params["wu"], params["bu"]))
    cat2 = jnp.concatenate([r * h, x], axis=1)
    return (1.0 - u) * h + u * jnp.tanh(conv(cat2, params["ws"], params["bs"]))


def init_params(key, in_channels, out_channels):
    """Deterministic synthetic init (Conv2d-like uniform, fan_in = Ccat*3*3)."""
    ccat = in_channels + out_channels
    bound = 1.0 / jnp.sqrt(ccat * 3.0 * 3.0)
    keys = jax.random.split(key, 6)
    u = lambda k, s: jax.random.uniform(k, s, jnp.float32, -bound, bound)
    return {
        "wr": u(keys[0], (out_channels, ccat, 3, 3)), "br": u(keys[1], (out_channels,)),
        "wu": u(keys[2], (out_channels, ccat, 3, 3)), "bu": u(keys[3], (out_channels,)),
        "ws": u(keys[4], (out_channels, ccat, 3, 3)), "bs": u(keys[5], (out_channels,)),
    }


if __name__ == "__main__":
    B, Cin, Cout, H, W = 2, 8, 8, 16, 16

    key = jax.random.PRNGKey(0)
    kx, kh, kp = jax.random.split(key, 3)
    x = jax.random.normal(kx, (B, Cin, H, W), jnp.float32)
    h = jax.random.normal(kh, (B, Cout, H, W), jnp.float32)
    params = init_params(kp, Cin, Cout)

    out = conv_gru_cell(x, h, params)
    out = jax.block_until_ready(out)

    ref = jax.block_until_ready(conv_gru_cell_ref(x, h, params))
    assert out.shape == (B, Cout, H, W)
    assert jnp.allclose(out, ref, atol=1e-4, rtol=1e-4), "mismatch vs JAX reference"

    print("KERNEL_OK")
</pallas_src>

<mosaic_0001>
module attributes {stable_mosaic.version = 11 : i64} {
  func.func @kernel(%arg0: i32, %arg1: memref<1x8x256xf32, #tpu.memory_space<vmem>>, %arg2: memref<1x8x256xf32, #tpu.memory_space<vmem>>, %arg3: memref<24x72xf32, #tpu.memory_space<vmem>>, %arg4: memref<16x72xf32, #tpu.memory_space<vmem>>, %arg5: memref<8x72xf32, #tpu.memory_space<vmem>>, %arg6: memref<24x1xf32, #tpu.memory_space<vmem>>, %arg7: memref<1x8x256xf32, #tpu.memory_space<vmem>>) attributes {dimension_semantics = [#tpu.dimension_semantics<parallel>], iteration_bounds = array<i64: 2>, scalar_prefetch = 0 : i64, scratch_operands = 0 : i64, tpu.core_type = #tpu.core_type<tc>, window_params = [{transform_indices = @transform_0, window_bounds = array<i64: 1, 8, 256>}, {transform_indices = @transform_1, window_bounds = array<i64: 1, 8, 256>}, {pipeline_mode = #tpu.pipeline_mode<synchronous>, transform_indices = @transform_2, window_bounds = array<i64: 24, 72>}, {pipeline_mode = #tpu.pipeline_mode<synchronous>, transform_indices = @transform_3, window_bounds = array<i64: 16, 72>}, {pipeline_mode = #tpu.pipeline_mode<synchronous>, transform_indices = @transform_4, window_bounds = array<i64: 8, 72>}, {pipeline_mode = #tpu.pipeline_mode<synchronous>, transform_indices = @transform_5, window_bounds = array<i64: 24, 1>}, {transform_indices = @transform_6, window_bounds = array<i64: 1, 8, 256>}]} {
    %c0 = arith.constant 0 : index
    %c0_0 = arith.constant 0 : index
    %c0_1 = arith.constant 0 : index
    %0 = vector.load %arg1[%c0, %c0_0, %c0_1] : memref<1x8x256xf32, #tpu.memory_space<vmem>>, vector<1x8x256xf32>
    %1 = vector.shape_cast %0 : vector<1x8x256xf32> to vector<8x256xf32>
    %c0_2 = arith.constant 0 : index
    %c0_3 = arith.constant 0 : index
    %c0_4 = arith.constant 0 : index
    %2 = vector.load %arg2[%c0_2, %c0_3, %c0_4] : memref<1x8x256xf32, #tpu.memory_space<vmem>>, vector<1x8x256xf32>
    %3 = vector.shape_cast %2 : vector<1x8x256xf32> to vector<8x256xf32>
    %4 = tpu.iota {dimensions = array<i32: 1>} : vector<1x256xi32>
    %c16_i32 = arith.constant 16 : i32
    %c0_i32 = arith.constant 0 : i32
    %5 = arith.cmpi eq, %c16_i32, %c0_i32 : i32
    %c1_i32 = arith.constant 1 : i32
    %6 = arith.select %5, %c1_i32, %c16_i32 : i32
    %7 = vector.broadcast %6 : i32 to vector<1x256xi32>
    %8 = arith.remsi %4, %7 : vector<1x256xi32>
    %c0_i32_5 = arith.constant 0 : i32
    %9 = vector.broadcast %c0_i32_5 : i32 to vector<1x256xi32>
    %10 = arith.cmpi ne, %8, %9 : vector<1x256xi32>
    %c0_i32_6 = arith.constant 0 : i32
    %11 = vector.broadcast %c0_i32_6 : i32 to vector<1x256xi32>
    %12 = arith.cmpi slt, %8, %11 : vector<1x256xi32>
    %c0_i32_7 = arith.constant 0 : i32
    %13 = arith.cmpi slt, %6, %c0_i32_7 : i32
    %14 = vector.broadcast %13 : i1 to vector<1x256xi1>
    %15 = vector.broadcast %14 : vector<1x256xi1> to vector<1x256xi1>
    %16 = arith.xori %12, %15 : vector<1x256xi1>
    %17 = arith.andi %16, %10 : vector<1x256xi1>
    %18 = vector.broadcast %6 : i32 to vector<1x256xi32>
    %19 = arith.addi %8, %18 : vector<1x256xi32>
    %20 = arith.select %17, %19, %8 : vector<1x256xi1>, vector<1x256xi32>
    %c1_i32_8 = arith.constant 1 : i32
    %21 = vector.broadcast %c1_i32_8 : i32 to vector<1x256xi32>
    %22 = arith.cmpi sge, %20, %21 : vector<1x256xi32>
    %23 = arith.extui %22 : vector<1x256xi1> to vector<1x256xi32>
    %24 = arith.sitofp %23 : vector<1x256xi32> to vector<1x256xf32>
    %c14_i32 = arith.constant 14 : i32
    %25 = vector.broadcast %c14_i32 : i32 to vector<1x256xi32>
    %26 = arith.cmpi sle, %20, %25 : vector<1x256xi32>
    %27 = arith.extui %26 : vector<1x256xi1> to vector<1x256xi32>
    %28 = arith.sitofp %27 : vector<1x256xi32> to vector<1x256xf32>
    %c0_i32_9 = arith.constant 0 : i32
    %29 = arith.sitofp %c0_i32_9 : i32 to f32
    %30 = vector.broadcast %29 : f32 to vector<8x17xf32>
    %31 = tpu.concatenate %30, %1 in 1 : vector<8x17xf32>, vector<8x256xf32> -> vector<8x273xf32>
    %32 = vector.broadcast %29 : f32 to vector<8x17xf32>
    %33 = tpu.concatenate %31, %32 in 1 : vector<8x273xf32>, vector<8x17xf32> -> vector<8x290xf32>
    %34 = vector.extract_strided_slice %33 {offsets = [0, 0], sizes = [8, 256], strides = [1, 1]} : vector<8x290xf32> to vector<8x256xf32>
    %35 = vector.broadcast %24 : vector<1x256xf32> to vector<8x256xf32>
    %36 = arith.mulf %34, %35 : vector<8x256xf32>
    %37 = vector.extract_strided_slice %33 {offsets = [0, 1], sizes = [8, 256], strides = [1, 1]} : vector<8x290xf32> to vector<8x256xf32>
    %38 = vector.extract_strided_slice %33 {offsets = [0, 2], sizes = [8, 256], strides = [1, 1]} : vector<8x290xf32> to vector<8x256xf32>
    %39 = vector.broadcast %28 : vector<1x256xf32> to vector<8x256xf32>
    %40 = arith.mulf %38, %39 : vector<8x256xf32>
    %41 = vector.extract_strided_slice %33 {offsets = [0, 16], sizes = [8, 256], strides = [1, 1]} : vector<8x290xf32> to vector<8x256xf32>
    %42 = vector.broadcast %24 : vector<1x256xf32> to vector<8x256xf32>
    %43 = arith.mulf %41, %42 : vector<8x256xf32>
    %44 = vector.extract_strided_slice %33 {offsets = [0, 17], sizes = [8, 256], strides = [1, 1]} : vector<8x290xf32> to vector<8x256xf32>
    %45 = vector.extract_strided_slice %33 {offsets = [0, 18], sizes = [8, 256], strides = [1, 1]} : vector<8x290xf32> to vector<8x256xf32>
    %46 = vector.broadcast %28 : vector<1x256xf32> to vector<8x256xf32>
    %47 = arith.mulf %45, %46 : vector<8x256xf32>
    %48 = vector.extract_strided_slice %33 {offsets = [0, 32], sizes = [8, 256], strides = [1, 1]} : vector<8x290xf32> to vector<8x256xf32>
    %49 = vector.broadcast %24 : vector<1x256xf32> to vector<8x256xf32>
    %50 = arith.mulf %48, %49 : vector<8x256xf32>
    %51 = vector.extract_strided_slice %33 {offsets = [0, 33], sizes = [8, 256], strides = [1, 1]} : vector<8x290xf32> to vector<8x256xf32>
    %52 = vector.extract_strided_slice %33 {offsets = [0, 34], sizes = [8, 256], strides = [1, 1]} : vector<8x290xf32> to vector<8x256xf32>
    %53 = vector.broadcast %28 : vector<1x256xf32> to vector<8x256xf32>
    %54 = arith.mulf %52, %53 : vector<8x256xf32>
    %55 = tpu.concatenate %36, %37, %40, %43, %44, %47, %50, %51, %54 in 0 : vector<8x256xf32>, vector<8x256xf32>, vector<8x256xf32>, vector<8x256xf32>, vector<8x256xf32>, vector<8x256xf32>, vector<8x256xf32>, vector<8x256xf32>, vector<8x256xf32> -> vector<72x256xf32>
    %c0_i32_10 = arith.constant 0 : i32
    %56 = arith.sitofp %c0_i32_10 : i32 to f32
    %57 = vector.broadcast %56 : f32 to vector<8x17xf32>
    %58 = tpu.concatenate %57, %3 in 1 : vector<8x17xf32>, vector<8x256xf32> -> vector<8x273xf32>
    %59 = vector.broadcast %56 : f32 to vector<8x17xf32>
    %60 = tpu.concatenate %58, %59 in 1 : vector<8x273xf32>, vector<8x17xf32> -> vector<8x290xf32>
    %61 = vector.extract_strided_slice %60 {offsets = [0, 0], sizes = [8, 256], strides = [1, 1]} : vector<8x290xf32> to vector<8x256xf32>
    %62 = vector.broadcast %24 : vector<1x256xf32> to vector<8x256xf32>
    %63 = arith.mulf %61, %62 : vector<8x256xf32>
    %64 = vector.extract_strided_slice %60 {offsets = [0, 1], sizes = [8, 256], strides = [1, 1]} : vector<8x290xf32> to vector<8x256xf32>
    %65 = vector.extract_strided_slice %60 {offsets = [0, 2], sizes = [8, 256], strides = [1, 1]} : vector<8x290xf32> to vector<8x256xf32>
    %66 = vector.broadcast %28 : vector<1x256xf32> to vector<8x256xf32>
    %67 = arith.mulf %65, %66 : vector<8x256xf32>
    %68 = vector.extract_strided_slice %60 {offsets = [0, 16], sizes = [8, 256], strides = [1, 1]} : vector<8x290xf32> to vector<8x256xf32>
    %69 = vector.broadcast %24 : vector<1x256xf32> to vector<8x256xf32>
    %70 = arith.mulf %68, %69 : vector<8x256xf32>
    %71 = vector.extract_strided_slice %60 {offsets = [0, 17], sizes = [8, 256], strides = [1, 1]} : vector<8x290xf32> to vector<8x256xf32>
    %72 = vector.extract_strided_slice %60 {offsets = [0, 18], sizes = [8, 256], strides = [1, 1]} : vector<8x290xf32> to vector<8x256xf32>
    %73 = vector.broadcast %28 : vector<1x256xf32> to vector<8x256xf32>
    %74 = arith.mulf %72, %73 : vector<8x256xf32>
    %75 = vector.extract_strided_slice %60 {offsets = [0, 32], sizes = [8, 256], strides = [1, 1]} : vector<8x290xf32> to vector<8x256xf32>
    %76 = vector.broadcast %24 : vector<1x256xf32> to vector<8x256xf32>
    %77 = arith.mulf %75, %76 : vector<8x256xf32>
    %78 = vector.extract_strided_slice %60 {offsets = [0, 33], sizes = [8, 256], strides = [1, 1]} : vector<8x290xf32> to vector<8x256xf32>
    %79 = vector.extract_strided_slice %60 {offsets = [0, 34], sizes = [8, 256], strides = [1, 1]} : vector<8x290xf32> to vector<8x256xf32>
    %80 = vector.broadcast %28 : vector<1x256xf32> to vector<8x256xf32>
    %81 = arith.mulf %79, %80 : vector<8x256xf32>
    %82 = tpu.concatenate %63, %64, %67, %70, %71, %74, %77, %78, %81 in 0 : vector<8x256xf32>, vector<8x256xf32>, vector<8x256xf32>, vector<8x256xf32>, vector<8x256xf32>, vector<8x256xf32>, vector<8x256xf32>, vector<8x256xf32>, vector<8x256xf32> -> vector<72x256xf32>
    %c0_11 = arith.constant 0 : index
    %c0_12 = arith.constant 0 : index
    %83 = vector.load %arg3[%c0_11, %c0_12] : memref<24x72xf32, #tpu.memory_space<vmem>>, vector<24x72xf32>
    %cst = arith.constant dense<0.000000e+00> : vector<24x256xf32>
    %84 = tpu.matmul %83, %55, %cst {dimension_numbers = #tpu.dot_dimension_numbers<[1], [0], [0], [1], [0, 0, 1, 1], [], []>} : vector<24x72xf32>, vector<72x256xf32>, vector<24x256xf32> -> vector<24x256xf32>
    %c0_13 = arith.constant 0 : index
    %c0_14 = arith.constant 0 : index
    %85 = vector.load %arg4[%c0_13, %c0_14] : memref<16x72xf32, #tpu.memory_space<vmem>>, vector<16x72xf32>
    %cst_15 = arith.constant dense<0.000000e+00> : vector<16x256xf32>
    %86 = tpu.matmul %85, %82, %cst_15 {dimension_numbers = #tpu.dot_dimension_numbers<[1], [0], [0], [1], [0, 0, 1, 1], [], []>} : vector<16x72xf32>, vector<72x256xf32>, vector<16x256xf32> -> vector<16x256xf32>
    %c0_16 = arith.constant 0 : index
    %c0_17 = arith.constant 0 : index
    %87 = vector.load %arg6[%c0_16, %c0_17] : memref<24x1xf32, #tpu.memory_space<vmem>>, vector<24x1xf32>
    %88 = vector.extract_strided_slice %84 {offsets = [0, 0], sizes = [8, 256], strides = [1, 1]} : vector<24x256xf32> to vector<8x256xf32>
    %89 = vector.extract_strided_slice %86 {offsets = [0, 0], sizes = [8, 256], strides = [1, 1]} : vector<16x256xf32> to vector<8x256xf32>
    %90 = arith.addf %88, %89 : vector<8x256xf32>
    %91 = vector.extract_strided_slice %87 {offsets = [0, 0], sizes = [8, 1], strides = [1, 1]} : vector<24x1xf32> to vector<8x1xf32>
    %92 = vector.broadcast %91 : vector<8x1xf32> to vector<8x256xf32>
    %93 = arith.addf %90, %92 : vector<8x256xf32>
    %94 = arith.negf %93 : vector<8x256xf32>
    %95 = math.exp %94 : vector<8x256xf32>
    %cst_18 = arith.constant 1.000000e+00 : f32
    %96 = vector.broadcast %cst_18 : f32 to vector<8x256xf32>
    %97 = arith.addf %96, %95 : vector<8x256xf32>
    %98 = arith.divf %96, %97 : vector<8x256xf32>
    %99 = vector.extract_strided_slice %84 {offsets = [8, 0], sizes = [8, 256], strides = [1, 1]} : vector<24x256xf32> to vector<8x256xf32>
    %100 = vector.extract_strided_slice %86 {offsets = [8, 0], sizes = [8, 256], strides = [1, 1]} : vector<16x256xf32> to vector<8x256xf32>
    %101 = arith.addf %99, %100 : vector<8x256xf32>
    %102 = vector.extract_strided_slice %87 {offsets = [8, 0], sizes = [8, 1], strides = [1, 1]} : vector<24x1xf32> to vector<8x1xf32>
    %103 = vector.broadcast %102 : vector<8x1xf32> to vector<8x256xf32>
    %104 = arith.addf %101, %103 : vector<8x256xf32>
    %105 = arith.negf %104 : vector<8x256xf32>
    %106 = math.exp %105 : vector<8x256xf32>
    %cst_19 = arith.constant 1.000000e+00 : f32
    %107 = vector.broadcast %cst_19 : f32 to vector<8x256xf32>
    %108 = arith.addf %107, %106 : vector<8x256xf32>
    %109 = arith.divf %107, %108 : vector<8x256xf32>
    %110 = arith.mulf %98, %3 : vector<8x256xf32>
    %c0_i32_20 = arith.constant 0 : i32
    %111 = arith.sitofp %c0_i32_20 : i32 to f32
    %112 = vector.broadcast %111 : f32 to vector<8x17xf32>
    %113 = tpu.concatenate %112, %110 in 1 : vector<8x17xf32>, vector<8x256xf32> -> vector<8x273xf32>
    %114 = vector.broadcast %111 : f32 to vector<8x17xf32>
    %115 = tpu.concatenate %113, %114 in 1 : vector<8x273xf32>, vector<8x17xf32> -> vector<8x290xf32>
    %116 = vector.extract_strided_slice %115 {offsets = [0, 0], sizes = [8, 256], strides = [1, 1]} : vector<8x290xf32> to vector<8x256xf32>
    %117 = vector.broadcast %24 : vector<1x256xf32> to vector<8x256xf32>
    %118 = arith.mulf %116, %117 : vector<8x256xf32>
    %119 = vector.extract_strided_slice %115 {offsets = [0, 1], sizes = [8, 256], strides = [1, 1]} : vector<8x290xf32> to vector<8x256xf32>
    %120 = vector.extract_strided_slice %115 {offsets = [0, 2], sizes = [8, 256], strides = [1, 1]} : vector<8x290xf32> to vector<8x256xf32>
    %121 = vector.broadcast %28 : vector<1x256xf32> to vector<8x256xf32>
    %122 = arith.mulf %120, %121 : vector<8x256xf32>
    %123 = vector.extract_strided_slice %115 {offsets = [0, 16], sizes = [8, 256], strides = [1, 1]} : vector<8x290xf32> to vector<8x256xf32>
    %124 = vector.broadcast %24 : vector<1x256xf32> to vector<8x256xf32>
    %125 = arith.mulf %123, %124 : vector<8x256xf32>
    %126 = vector.extract_strided_slice %115 {offsets = [0, 17], sizes = [8, 256], strides = [1, 1]} : vector<8x290xf32> to vector<8x256xf32>
    %127 = vector.extract_strided_slice %115 {offsets = [0, 18], sizes = [8, 256], strides = [1, 1]} : vector<8x290xf32> to vector<8x256xf32>
    %128 = vector.broadcast %28 : vector<1x256xf32> to vector<8x256xf32>
    %129 = arith.mulf %127, %128 : vector<8x256xf32>
    %130 = vector.extract_strided_slice %115 {offsets = [0, 32], sizes = [8, 256], strides = [1, 1]} : vector<8x290xf32> to vector<8x256xf32>
    %131 = vector.broadcast %24 : vector<1x256xf32> to vector<8x256xf32>
    %132 = arith.mulf %130, %131 : vector<8x256xf32>
    %133 = vector.extract_strided_slice %115 {offsets = [0, 33], sizes = [8, 256], strides = [1, 1]} : vector<8x290xf32> to vector<8x256xf32>
    %134 = vector.extract_strided_slice %115 {offsets = [0, 34], sizes = [8, 256], strides = [1, 1]} : vector<8x290xf32> to vector<8x256xf32>
    %135 = vector.broadcast %28 : vector<1x256xf32> to vector<8x256xf32>
    %136 = arith.mulf %134, %135 : vector<8x256xf32>
    %137 = tpu.concatenate %118, %119, %122, %125, %126, %129, %132, %133, %136 in 0 : vector<8x256xf32>, vector<8x256xf32>, vector<8x256xf32>, vector<8x256xf32>, vector<8x256xf32>, vector<8x256xf32>, vector<8x256xf32>, vector<8x256xf32>, vector<8x256xf32> -> vector<72x256xf32>
    %138 = vector.extract_strided_slice %84 {offsets = [16, 0], sizes = [8, 256], strides = [1, 1]} : vector<24x256xf32> to vector<8x256xf32>
    %c0_21 = arith.constant 0 : index
    %c0_22 = arith.constant 0 : index
    %139 = vector.load %arg5[%c0_21, %c0_22] : memref<8x72xf32, #tpu.memory_space<vmem>>, vector<8x72xf32>
    %cst_23 = arith.constant dense<0.000000e+00> : vector<8x256xf32>
    %140 = tpu.matmul %139, %137, %cst_23 {dimension_numbers = #tpu.dot_dimension_numbers<[1], [0], [0], [1], [0, 0, 1, 1], [], []>} : vector<8x72xf32>, vector<72x256xf32>, vector<8x256xf32> -> vector<8x256xf32>
    %141 = arith.addf %138, %140 : vector<8x256xf32>
    %142 = vector.extract_strided_slice %87 {offsets = [16, 0], sizes = [8, 1], strides = [1, 1]} : vector<24x1xf32> to vector<8x1xf32>
    %143 = vector.broadcast %142 : vector<8x1xf32> to vector<8x256xf32>
    %144 = arith.addf %141, %143 : vector<8x256xf32>
    %145 = math.tanh %144 : vector<8x256xf32>
    %cst_24 = arith.constant 1.000000e+00 : f32
    %146 = vector.broadcast %cst_24 : f32 to vector<8x256xf32>
    %147 = arith.subf %146, %109 : vector<8x256xf32>
    %148 = arith.mulf %147, %3 : vector<8x256xf32>
    %149 = arith.mulf %109, %145 : vector<8x256xf32>
    %150 = arith.addf %148, %149 : vector<8x256xf32>
    %c0_25 = arith.constant 0 : index
    %c0_26 = arith.constant 0 : index
    %c0_27 = arith.constant 0 : index
    %151 = vector.load %arg7[%c0_25, %c0_26, %c0_27] : memref<1x8x256xf32, #tpu.memory_space<vmem>>, vector<1x8x256xf32>
    %152 = vector.shape_cast %151 : vector<1x8x256xf32> to vector<8x256xf32>
    %153 = vector.shape_cast %150 : vector<8x256xf32> to vector<1x8x256xf32>
    tpu.vector_store %arg7[%c0_25, %c0_26, %c0_27], %153 {strides = array<i32>} : memref<1x8x256xf32, #tpu.memory_space<vmem>>, vector<1x8x256xf32>,
    return
  }
  func.func @transform_0(%arg0: i32) -> (i32, i32, i32) {
    %c0_i32 = arith.constant 0 : i32
    %c0_i32_0 = arith.constant 0 : i32
    %c0_i32_1 = arith.constant 0 : i32
    return %arg0, %c0_i32, %c0_i32_0 : i32, i32, i32
  }
  func.func @transform_1(%arg0: i32) -> (i32, i32, i32) {
    %c0_i32 = arith.constant 0 : i32
    %c0_i32_0 = arith.constant 0 : i32
    %c0_i32_1 = arith.constant 0 : i32
    return %arg0, %c0_i32, %c0_i32_0 : i32, i32, i32
  }
  func.func @transform_2(%arg0: i32) -> (i32, i32) {
    %c0_i32 = arith.constant 0 : i32
    %c0_i32_0 = arith.constant 0 : i32
    %c0_i32_1 = arith.constant 0 : i32
    return %c0_i32, %c0_i32_0 : i32, i32
  }
  func.func @transform_3(%arg0: i32) -> (i32, i32) {
    %c0_i32 = arith.constant 0 : i32
    %c0_i32_0 = arith.constant 0 : i32
    %c0_i32_1 = arith.constant 0 : i32
    return %c0_i32, %c0_i32_0 : i32, i32
  }
  func.func @transform_4(%arg0: i32) -> (i32, i32) {
    %c0_i32 = arith.constant 0 : i32
    %c0_i32_0 = arith.constant 0 : i32
    %c0_i32_1 = arith.constant 0 : i32
    return %c0_i32, %c0_i32_0 : i32, i32
  }
  func.func @transform_5(%arg0: i32) -> (i32, i32) {
    %c0_i32 = arith.constant 0 : i32
    %c0_i32_0 = arith.constant 0 : i32
    %c0_i32_1 = arith.constant 0 : i32
    return %c0_i32, %c0_i32_0 : i32, i32
  }
  func.func @transform_6(%arg0: i32) -> (i32, i32, i32) {
    %c0_i32 = arith.constant 0 : i32
    %c0_i32_0 = arith.constant 0 : i32
    %c0_i32_1 = arith.constant 0 : i32
    return %arg0, %c0_i32, %c0_i32_0 : i32, i32, i32
  }
}

</mosaic_0001>

<bundles_post_ra>
// kernel: tpu_custom_call.1
= control target key start
LH: loop header
LB: loop body
LE: loop exit
PB: predicated region body
PF: predicated region fallthrough
CT: control target
= control target key end

     0   :  { %s2230_s0 = inlined_call_operand.hbm [shape: f32[2,8,256], index: 0, kind: input, shape index: {}]   ;;  %s2231_s1 = inlined_call_operand.hbm [shape: f32[2,8,256], index: 1, kind: input, shape index: {}]   ;;  %s2232_s2 = inlined_call_operand.vmem [shape: f32[24,72], index: 2, kind: input, shape index: {}]   ;;  %s2233_s3 = inlined_call_operand.hbm [shape: f32[16,72], index: 3, kind: input, shape index: {}]   ;;  %s2234_s4 = inlined_call_operand.vmem [shape: f32[8,72], index: 4, kind: input, shape index: {}]   ;;  %s2235_s5 = inlined_call_operand.vmem [shape: f32[24,1], index: 5, kind: input, shape index: {}]   ;;  %s2236_s6 = inlined_call_operand.hbm [shape: f32[2,8,256], index: 6, kind: output, shape index: {}]  }
   0x1   :  { %2242 = sst [smem:[#allocation15_spill]] %s2233_s3 }
   0x2   :  { %11 = vsyncpa [#allocation3], 0 }
   0x3   :  { %13 = vsyncpa [#allocation3 + $0x1], 0 }
   0x4   :  { %14 = vsyncpa [#allocation6], 0 }
   0x5   :  { %16 = vsyncpa [#allocation6 + $0x1], 0 }
   0x6   :  { %17 = vsyncpa [#allocation4], 0 }
   0x7   :  { %19 = vsyncpa [#allocation4 + $0x1], 0  ;;  %s1617_s21 = smov 0   ;;  %s1619_s22 = smov 0  }
   0x8   :  { %s1621_s23 = smov 0   ;;  %s1623_s24 = smov 0  }
   0x9 LB: > { %2243 = sst [smem:[#allocation13_spill]] %s1554_s23  ;;  %s1638_s25 = sadd.s32 4294967295, %s1558_s24   ;;  %s1558_s24 = sphi %s1623_s24, %s2264_s24   ;;  %s1554_s23 = sphi %s1621_s23, %s2261_s23   ;;  %s1550_s22 = sphi %s1619_s22, %s2263_s22   ;;  %s1546_s21 = sphi %s1617_s21, %s2262_s21  }
   0xa   : > { %s1240_s26 = sadd.s32 4294967294, %s1558_s24   ;;  %p45_p0 = scmp.ne.s32.totalorder %s1550_s22, %s1546_s21 }
   0xb   : > { %p2238_p1 = scmp.eq.s32.totalorder %s1638_s25, 0  ;;  %p185_p3 = scmp.eq.s32.totalorder %s1240_s26, 1 }
   0xc   : > { %p1241_p5 = scmp.ge.s32.totalorder %s1558_s24, 1  ;;  %p192_p7 = scmp.lt.s32.totalorder %s1558_s24, 3 }
   0xd   : > { %p1647_p4 = por %p2238_p1, %p45_p0  ;;  %p1652_p6 = por %p185_p3, %p45_p0 }
   0xe   : > { %p1657_p8 = pnand %p1241_p5, %p192_p7  ;;  %s1560_s30 = smov [#allocation7]  }
   0xf   : > { %s2244_s27 = scalar_select %p1647_p4, 1, 0 }
  0x10   : > { %s2245_s28 = scalar_select %p1652_p6, 1, 0 }
  0x11   : > { %s2246_s29 = scalar_select %p1657_p8, 1, 0 }
  0x12   : > { %s207_s7 = sshll.u32 %s1560_s30, 4  ;;  %p1287_p9 = pneg %p1657_p8  ;;  %s208_s7 = int_to_ptr.vmem [resolvable:$true] %s207_s7 }
  0x13   : > { %s1671_s9 = sadd.s32 1, %s1558_s24   ;;  %s32_s10 = sadd.s32 1, %s1554_s23 }
  0x14   : > { %p1666_p11 = pnand %p1287_p9, %p2238_p1  ;;  %s29_s11 = ssub.s32 %s1558_s24, %s1671_s9 }
  0x15   : > { %s1415_s12 = scalar_lea.vmem %s208_s7, 256  ;;  %p1423_p5 = scmp.lt.s32.totalorder %s208_s7, %s208_s7 }
  0x16   : > { %p1406_p12 = pneg %p1666_p11  ;;  %p1416_p13 = scmp.ne.s32.totalorder %s208_s7, %s1415_s12 }
  0x17   : > { %p1424_p7 = scmp.lt.s32.totalorder %s1415_s12, %s1415_s12 }
  0x18   : > { %p1418_p0 = pnand %p1416_p13, %p1406_p12 }
  0x19   : > { %p1425_p10 = por %p1424_p7, %p1423_p5 }
  0x1a   : > { %p1419_p3 = pneg %p1418_p0 }
  0x1c   : > { %p1426_p2 = pnand %p1425_p10, %p1419_p3 }
  0x1e   : > { %1429 = shalt.err (!%p1426_p2)
}
  0x1f   : > { %s1561_s13 = smov 128   ;;  %s1562_s14 = smov 8  }
  0x20   : > { %s2248_s3 = sld [smem:[#allocation15_spill]]  ;;  %p30_p9 = scmp.eq.s32.totalorder %s29_s11, 0 }
  0x21   : > { %p39_p12 = scmp.ne.s32.totalorder %s1554_s23, %s1550_s22  ;;  %p40_p10 = scmp.eq.s32.totalorder %s1558_s24, 0 }
  0x22   : > { %p1303_p2 = scmp.lt.s32.totalorder %s1558_s24, 2  ;;  %p2250_p0 = scmp.eq.s32.totalorder %s1638_s25, 1 }
  0x23   : > { %s1688_s17 = scalar_select %p30_p9, %s1554_s23, %s32_s10  }
  0x24   : > { %p41_p13 = por %p40_p10, %p39_p12  ;;  %p1692_p3 = por %p2250_p0, %p39_p12 }
  0x25   : > { %2249 = sst [smem:[#allocation14_spill]] %s1688_s17  ;;  %s227_s19 = sand.u32 1, %s1554_s23  }
  0x26   : > { %1290 = dma.hbm_to_vmem [thread:$0]  (!%p1666_p11), %s2248_s3, 256, %s208_s7, [#allocation6], %s1561_s13, %s1561_s13, %s1562_s14  }
  0x27   : > { %s2251_s18 = scalar_select %p1692_p3, 1, 0 }
  0x28   : > { %s1274_s20 = sshll.u32 %s1558_s24, 8  ;;  %s1698_s26 = sshll.u32 %s227_s19, 4 }
  0x29   : > { %s1703_s7 = scalar_lea.hbm %s2230_s0, %s1274_s20  ;;  %s231_s10 = scalar_lea.vmem [#allocation2], %s1698_s26 }
  0x2a   : > { %s239_s11 = sshll.u32 %s231_s10, 4  ;;  %p1706_p11 = pnand %p1303_p2, %p41_p13  ;;  %s240_s11 = int_to_ptr.vmem [resolvable:$true] %s239_s11 }
  0x2b   : > { %s1713_s15 = scalar_lea.hbm %s2231_s1, %s1274_s20  ;;  %s228_s16 = scalar_lea.sflag [#allocation3], %s227_s19 }
  0x2c   : > { %s1430_s30 = scalar_lea.hbm %s1703_s7, 256  ;;  %p1432_p7 = pneg %p1706_p11 }
  0x2d   : > { %p1431_p5 = scmp.ne.s32.totalorder %s1703_s7, %s1430_s30  ;;  %s1435_s3 = scalar_lea.hbm %s2230_s0, 512 }
  0x2e   : > { %p1436_p10 = scmp.lt.s32.totalorder %s1703_s7, %s2230_s0  ;;  %p1437_p2 = scmp.lt.s32.totalorder %s1435_s3, %s1430_s30 }
  0x2f   : > { %p1433_p9 = pnand %p1432_p7, %p1431_p5 }
  0x30   : > { %p1438_p13 = por %p1437_p2, %p1436_p10 }
  0x31   : > { %p1434_p12 = pneg %p1433_p9 }
  0x33   : > { %p1439_p0 = pnand %p1438_p13, %p1434_p12 }
  0x35   : > { %1442 = shalt.err (!%p1439_p0)
}
  0x36   : > { %s1443_s19 = scalar_lea.vmem %s240_s11, 256  ;;  %s1563_s20 = smov [#allocation2]  }
  0x37   : > { %p1444_p1 = scmp.ne.s32.totalorder %s240_s11, %s1443_s19  ;;  %s1448_s13 = sshll.u32 %s1563_s20, 4  ;;  %s1449_s13 = int_to_ptr.vmem [resolvable:$false] %s1448_s13 }
  0x38   : > { %s1450_s14 = scalar_lea.vmem %s1449_s13, 512  ;;  %p1451_p9 = scmp.lt.s32.totalorder %s240_s11, %s1449_s13 }
  0x39   : > { %p1446_p6 = pnand %p1444_p1, %p1432_p7  ;;  %p1452_p3 = scmp.lt.s32.totalorder %s1450_s14, %s1443_s19 }
  0x3b   : > { %p1447_p5 = pneg %p1446_p6  ;;  %p1453_p4 = por %p1452_p3, %p1451_p9 }
  0x3d   : > { %p1454_p8 = pnand %p1453_p4, %p1447_p5 }
  0x3f   : > { %1457 = shalt.err (!%p1454_p8)
}
  0x40   : > { %1294 = dma.hbm_to_vmem [thread:$0]  (!%p1706_p11), %s1703_s7, 256, %s240_s11, %s228_s16  }
  0x41   : > { %s246_s3 = sand.u32 1, %s1558_s24   ;;  %s250_s23 = scalar_lea.vmem [#allocation5], %s1698_s26 }
  0x42   : > { %s258_s17 = sshll.u32 %s250_s23, 4  ;;  %s247_s30 = scalar_lea.sflag [#allocation6], %s246_s3  ;;  %s259_s17 = int_to_ptr.vmem [resolvable:$true] %s258_s17 }
  0x43   : > { %s1458_s8 = scalar_lea.hbm %s1713_s15, 256  ;;  %s1463_s20 = scalar_lea.hbm %s2231_s1, 512 }
  0x44   : > { %p1459_p1 = scmp.ne.s32.totalorder %s1713_s15, %s1458_s8  ;;  %p1464_p8 = scmp.lt.s32.totalorder %s1713_s15, %s2231_s1 }
  0x45   : > { %p1465_p3 = scmp.lt.s32.totalorder %s1463_s20, %s1458_s8 }
  0x46   : > { %p1461_p4 = pnand %p1459_p1, %p1432_p7 }
  0x47   : > { %p1466_p12 = por %p1465_p3, %p1464_p8 }
  0x48   : > { %p1462_p6 = pneg %p1461_p4 }
  0x4a   : > { %p1467_p10 = pnand %p1466_p12, %p1462_p6 }
  0x4c   : > { %1470 = shalt.err (!%p1467_p10)
}
  0x4d   : > { %s1471_s26 = scalar_lea.vmem %s259_s17, 256  ;;  %s1564_s7 = smov [#allocation5]  }
  0x4e   : > { %p1472_p2 = scmp.ne.s32.totalorder %s259_s17, %s1471_s26  ;;  %s1476_s11 = sshll.u32 %s1564_s7, 4  ;;  %s1477_s11 = int_to_ptr.vmem [resolvable:$false] %s1476_s11 }
  0x4f   : > { %s1478_s16 = scalar_lea.vmem %s1477_s11, 512  ;;  %p1479_p5 = scmp.lt.s32.totalorder %s259_s17, %s1477_s11 }
  0x50   : > { %p1474_p13 = pnand %p1472_p2, %p1432_p7  ;;  %p1480_p9 = scmp.lt.s32.totalorder %s1478_s16, %s1471_s26 }
  0x52   : > { %p1475_p0 = pneg %p1474_p13  ;;  %p1481_p1 = por %p1480_p9, %p1479_p5 }
  0x54   : > { %p1482_p4 = pnand %p1481_p1, %p1475_p0 }
  0x56   : > { %1485 = shalt.err (!%p1482_p4)
}
  0x57   : > { %1297 = dma.hbm_to_vmem [thread:$0]  (!%p1706_p11), %s1713_s15, 256, %s259_s17, %s247_s30  }
  0x58   : > { %p2253_p6 = scmp.ne.s32.totalorder %s2246_s29, 0 }
  0x59   : > { %s1758_s3 = sand.u32 (!%p2253_p6), 1, %s1550_s22   ;;  %p2254_p7 = scmp.ne.s32.totalorder (!%p2253_p6), %s2244_s27, 0 }
  0x5a   : > { %267 = sbr.rel (%p2253_p6) target bundleno = 1176 (0x498), region = 44  ;;  %s1761_s23 = sshll.u32 (!%p2253_p6), %s1758_s3, 4 }
  0x5b   : > { %s270_s8 = scalar_lea.sflag (!%p2253_p6), [#allocation3], %s1758_s3  ;;  %s273_s10 = scalar_lea.vmem (!%p2253_p6), [#allocation2], %s1761_s23 }
  0x5f   : > { %1529 = dma.done.wait (%p2254_p7), %s270_s8, 256  }
  0x60   : > { %1531 = vsyncadd (%p2254_p7), %s270_s8, 4294967040  ;;  %s278_s29 = sand.u32 1, %s1638_s25   ;;  %s282_s15 = scalar_lea.vmem [#allocation5], %s1761_s23 }
  0x61   : > { %s279_s12 = scalar_lea.sflag [#allocation6], %s278_s29 }
  0x62   : > { %1533 = dma.done.wait (%p2254_p7), %s279_s12, 256  }
  0x63   : > { %1535 = vsyncadd (%p2254_p7), %s279_s12, 4294967040  ;;  %p2255_p11 = scmp.eq.s32.totalorder %s1638_s25, 0 }
  0x65   : > { %1537 = dma.done.wait (%p2255_p11), [#allocation6], 256   ;;  %p2256_p8 = pmov %p2255_p11 }
  0x66   : > { %v324_v0 = vlaneseq  ;;  %v1565_v1 = vmov 0.0   ;;  %v1783_v6 = vld [vmem:[%s282_s15] sm:$0xff]  ;;  %s1566_s27 = smov 17   ;;  %v321_v10 = vld [vmem:[%s273_s10 + $0x8] sm:$0xff]  ;;  %s1567_s17 = smov 34   ;;  %vm369_vm4 = vcmask 138240  }
  0x67   : > { %1539 = vsyncadd (%p2256_p8), [#allocation6], 4294967040  ;;  %750 = vmatprep.mubr.f32.mxu0 %v1565_v1  ;;  %841 = vmatprep.mubr.f32.mxu1 %v1565_v1  ;;  %v320_v7 = vld [vmem:[%s273_s10] sm:$0xff]  ;;  %v1801_v15 = vld [vmem:[%s282_s15 + $0x8] sm:$0xff]  ;;  %s1568_s30 = smov 32   ;;  %s1569_s19 = smov 16  }
  0x68   : > { %v325_v2 = vand.u32 127, %v324_v0  ;;  %549 = vrot.lane.b32.xlu1 %v1783_v6, %s1566_s27  ;;  %365 = vrot.lane.b32.xlu0 %v320_v7, %s1566_s27  ;;  %s1570_s20 = smov 18   ;;  %s1571_s13 = smov 2   ;;  %vm434_vm5 = vcmask 277504   ;;  %vm422_vm6 = vcmask 261120   ;;  %vm410_vm7 = vcmask 146432  }
  0x69   : > { %s1572_s14 = smov 95   ;;  %s1573_s26 = smov 111   ;;  %vm398_vm8 = vcmask 130048   ;;  %vm384_vm9 = vcmask 15360   ;;  %vm542_vm10 = vcmask 769024   ;;  %vm528_vm11 = vcmask 777216  }
  0x6a   : > { %v326_v3 = vadd.s32 128, %v325_v2  ;;  %v331_v4 = vand.u32 15, %v325_v2  ;;  %s1574_s7 = smov 127   ;;  %s1575_s11 = smov 94   ;;  %vm517_vm12 = vcmask 785408   ;;  %vm503_vm13 = vcmask 900096  }
  0x6b   : > { %s1576_s16 = smov 96   ;;  %s1577_s8 = smov 110   ;;  %vm489_vm14 = vcmask 908288   ;;  %vm478_vm15 = vcmask 916480  }
  0x6c   : > { %v338_v5 = vand.u32 15, %v326_v3  ;;  %vm357_vm0 = vcmp.le.s32.totalorder %v331_v4, 14  ;;  %vm351_vm1 = vcmp.ge.s32.totalorder %v331_v4, 1  ;;  %367 = vrot.lane.b32.xlu0 %v321_v10, %s1566_s27  ;;  %s1578_s10 = smov 112   ;;  %s1579_s29 = smov 126  }
  0x6d   : > { %v1257_v8 = vsel %vm357_vm0, 1.0, %v1565_v1  ;;  %v1791_v11 = vsel %vm351_vm1, 1.0, %v1565_v1  ;;  %vm464_vm0 = vcmask 1031168   ;;  %vm450_vm1 = vcmask 1039360   ;;  %p2257_p12 = scmp.ne.s32.totalorder %s2251_s18, 0 }
  0x6e   : > { %vm358_vm2 = vcmp.le.s32.totalorder %v338_v5, 14  ;;  %vm352_vm3 = vcmp.ge.s32.totalorder %v338_v5, 1 }
  0x6f   : > { %v1258_v9 = vsel %vm358_vm2, 1.0, %v1565_v1  ;;  %v1794_v12 = vsel %vm352_vm3, 1.0, %v1565_v1  ;;  %vm676_vm2 = vcmask 588800  }
  0x70   : > { %v1357_v13 = vpack.i.bf16 %v1258_v9, %v1257_v8  ;;  %v1362_v14 = vpack.i.bf16 %v1794_v12, %v1791_v11  ;;  %551 = vrot.lane.b32.xlu0 %v1801_v15, %s1566_s27 }
  0x72   : > { %1358 = vrot.lane.b32.xlu1 %v1357_v13, %s1567_s17 }
  0x74   : > { %1368 = vrot.lane.b32.xlu0 %v1357_v13, %s1570_s20 }
  0x76   : > { %1363 = vrot.lane.b32.xlu1 %v1362_v14, %s1568_s30 }
  0x78   : > { %1378 = vrot.lane.b32.xlu0 %v1357_v13, %s1571_s13 }
  0x7a   : > { %1373 = vrot.lane.b32.xlu1 %v1362_v14, %s1569_s19  ;;  %v1580_v14 = vmov 0  }
  0x7b   : > { %1382 = vset.pattern.permute.xlu1 %v1580_v14  ;;  %1383 = vset.pattern.permute.xlu0 %v1580_v14 }
  0xda   : > { %v366_v16 = vpop.permute.xlu0 %365  ;;  %v550_v20 = vpop.permute.xlu1 %549 }
  0xdb   : > { %v1826_v24 = vsel %vm369_vm4, 0.0, %v550_v20  ;;  %v1829_v25 = vsel %vm369_vm4, 0.0, %v366_v16 }
  0xde   : > { %v368_v17 = vpop.permute.xlu0 %367 }
  0xdf   : > { %v1806_v18 = vsel %vm369_vm4, %v366_v16, %v368_v17  ;;  %v1809_v19 = vsel %vm369_vm4, %v368_v17, 0.0 }
  0xe0   : > { %526 = vrot.lane.b32.xlu0 %v1809_v19, %s1572_s14  ;;  %524 = vrot.lane.b32.xlu1 %v1806_v18, %s1572_s14 }
  0xe2   : > { %v552_v21 = vpop.permute.xlu0 %551 }
  0xe3   : > { %v1816_v22 = vsel %vm369_vm4, %v550_v20, %v552_v21  ;;  %v1819_v23 = vsel %vm369_vm4, %v552_v21, 0.0 }
  0xe4   : > { %654 = vrot.lane.b32.xlu0 %v1819_v23, %s1572_s14  ;;  %652 = vrot.lane.b32.xlu1 %v1816_v22, %s1572_s14  ;;  %v1359_v26 = vpop.permute.xlu1 %1358 }
  0xe5   : > { %v1851_v27 = vunpack.i.l.bf16 %v1359_v26  ;;  %v1887_v44 = vunpack.i.h.bf16 %v1359_v26 }
  0xe6   : > { %v1369_v32 = vpop.permute.xlu0 %1368 }
  0xe7   : > { %v573_v30 = vmul.f32 %v1851_v27, %v1826_v24  ;;  %v439_v31 = vmul.f32 %v1851_v27, %v1829_v25  ;;  %v1865_v33 = vunpack.i.l.bf16 %v1369_v32  ;;  %v1897_v47 = vsel %vm434_vm5, %v1851_v27, %v1887_v44 }
  0xe8   : > { %650 = vrot.lane.b32.xlu0 %v1826_v24, %s1572_s14  ;;  %522 = vrot.lane.b32.xlu1 %v1829_v25, %s1572_s14  ;;  %v1364_v28 = vpop.permute.xlu1 %1363  ;;  %v440_v48 = vmul.f32 %v1897_v47, %v1806_v18  ;;  %v441_v49 = vmul.f32 %v1887_v44, %v1809_v19  ;;  %v574_v51 = vmul.f32 %v1816_v22, %v1897_v47  ;;  %v1923_v56 = vunpack.i.h.bf16 %v1369_v32 }
  0xe9   : > { %v1857_v29 = vunpack.i.l.bf16 %v1364_v28  ;;  %v415_v38 = vmul.f32 %v1865_v33, %v1829_v25  ;;  %v567_v39 = vmul.f32 %v1865_v33, %v1826_v24  ;;  %v1905_v50 = vunpack.i.h.bf16 %v1364_v28 }
  0xea   : > { %v1379_v40 = vpop.permute.xlu0 %1378  ;;  %v575_v52 = vmul.f32 %v1887_v44, %v1819_v23  ;;  %v1933_v59 = vsel %vm410_vm7, %v1865_v33, %v1923_v56  ;;  %v417_v60 = vmul.f32 %v1923_v56, %v1809_v19  ;;  %v569_v63 = vmul.f32 %v1923_v56, %v1819_v23 }
  0xeb   : > { %v570_v34 = vmul.f32 %v1857_v29, %v1826_v24  ;;  %v427_v35 = vmul.f32 %v1857_v29, %v1829_v25  ;;  %v1881_v41 = vunpack.i.l.bf16 %v1379_v40  ;;  %v1915_v53 = vsel %vm422_vm6, %v1857_v29, %v1905_v50 }
  0xec   : > { %487 = vrot.lane.b32.xlu0 %v1809_v19, %s1573_s26  ;;  %485 = vrot.lane.b32.xlu1 %v1806_v18, %s1573_s26  ;;  %v1374_v36 = vpop.permute.xlu1 %1373  ;;  %v428_v54 = vmul.f32 %v1915_v53, %v1806_v18  ;;  %v429_v55 = vmul.f32 %v1905_v50, %v1809_v19  ;;  %v571_v57 = vmul.f32 %v1816_v22, %v1915_v53  ;;  %v1959_v5 = vunpack.i.h.bf16 %v1379_v40 }
  0xed   : > { %v1873_v37 = vunpack.i.l.bf16 %v1374_v36  ;;  %v389_v45 = vmul.f32 %v1881_v41, %v1829_v25  ;;  %v561_v46 = vmul.f32 %v1881_v41, %v1826_v24  ;;  %v572_v58 = vmul.f32 %v1905_v50, %v1819_v23 }
  0xee   : > { %v416_v61 = vmul.f32 %v1933_v59, %v1806_v18  ;;  %v1941_v62 = vunpack.i.h.bf16 %v1374_v36  ;;  %v568_v0 = vmul.f32 %v1816_v22, %v1933_v59  ;;  %v1969_v9 = vsel %vm384_vm9, %v1881_v41, %v1959_v5 }
  0xef   : > { %v403_v42 = vmul.f32 %v1873_v37, %v1829_v25  ;;  %v564_v43 = vmul.f32 %v1873_v37, %v1826_v24  ;;  %v391_v10 = vmul.f32 %v1959_v5, %v1809_v19  ;;  %v390_v13 = vmul.f32 %v1969_v9, %v1806_v18 }
  0xf0   : > { %618 = vrot.lane.b32.xlu0 %v1819_v23, %s1573_s26  ;;  %616 = vrot.lane.b32.xlu1 %v1816_v22, %s1573_s26  ;;  %v1951_v2 = vsel %vm398_vm8, %v1873_v37, %v1941_v62  ;;  %v405_v3 = vmul.f32 %v1941_v62, %v1809_v19  ;;  %v566_v7 = vmul.f32 %v1941_v62, %v1819_v23 }
  0xf1   : > { %v404_v4 = vmul.f32 %v1951_v2, %v1806_v18  ;;  %v565_v8 = vmul.f32 %v1816_v22, %v1951_v2  ;;  %v563_v16 = vmul.f32 %v1959_v5, %v1819_v23  ;;  %v562_v17 = vmul.f32 %v1816_v22, %v1969_v9 }
  0xf4   : > { %614 = vrot.lane.b32.xlu0 %v1826_v24, %s1573_s26  ;;  %483 = vrot.lane.b32.xlu1 %v1829_v25, %s1573_s26 }
  0xf8   : > { %448 = vrot.lane.b32.xlu0 %v1809_v19, %s1574_s7  ;;  %446 = vrot.lane.b32.xlu1 %v1806_v18, %s1574_s7  ;;  %v854_v19 = vld [vmem:[%s2235_s5] sm:$0xff] }
  0xfc   : > { %582 = vrot.lane.b32.xlu0 %v1819_v23, %s1574_s7  ;;  %580 = vrot.lane.b32.xlu1 %v1816_v22, %s1574_s7 }
 0x100   : > { %663 = vrot.lane.b32.xlu0 %v573_v30, %s1575_s11  ;;  %536 = vrot.lane.b32.xlu1 %v439_v31, %s1575_s11 }
 0x104   : > { %640 = vrot.lane.b32.xlu0 %v570_v34, %s1576_s16  ;;  %511 = vrot.lane.b32.xlu1 %v427_v35, %s1576_s16 }
 0x108   : > { %497 = vrot.lane.b32.xlu1 %v415_v38, %s1577_s8  ;;  %627 = vrot.lane.b32.xlu0 %v567_v39, %s1577_s8 }
 0x10c   : > { %472 = vrot.lane.b32.xlu1 %v403_v42, %s1578_s10  ;;  %604 = vrot.lane.b32.xlu0 %v564_v43, %s1578_s10 }
 0x110   : > { %458 = vrot.lane.b32.xlu1 %v389_v45, %s1579_s29  ;;  %591 = vrot.lane.b32.xlu0 %v561_v46, %s1579_s29 }
 0x114   : > { %538 = vrot.lane.b32.xlu1 %v440_v48, %s1575_s11  ;;  %540 = vrot.lane.b32.xlu0 %v441_v49, %s1575_s11 }
 0x118   : > { %665 = vrot.lane.b32.xlu1 %v574_v51, %s1575_s11  ;;  %667 = vrot.lane.b32.xlu0 %v575_v52, %s1575_s11 }
 0x11c   : > { %513 = vrot.lane.b32.xlu1 %v428_v54, %s1576_s16  ;;  %515 = vrot.lane.b32.xlu0 %v429_v55, %s1576_s16 }
 0x120   : > { %642 = vrot.lane.b32.xlu1 %v571_v57, %s1576_s16  ;;  %644 = vrot.lane.b32.xlu0 %v572_v58, %s1576_s16 }
 0x124   : > { %501 = vrot.lane.b32.xlu0 %v417_v60, %s1577_s8  ;;  %499 = vrot.lane.b32.xlu1 %v416_v61, %s1577_s8 }
 0x128   : > { %631 = vrot.lane.b32.xlu0 %v569_v63, %s1577_s8  ;;  %629 = vrot.lane.b32.xlu1 %v568_v0, %s1577_s8 }
 0x12c   : > { %476 = vrot.lane.b32.xlu0 %v405_v3, %s1578_s10  ;;  %474 = vrot.lane.b32.xlu1 %v404_v4, %s1578_s10 }
 0x130   : > { %608 = vrot.lane.b32.xlu0 %v566_v7, %s1578_s10  ;;  %606 = vrot.lane.b32.xlu1 %v565_v8, %s1578_s10 }
 0x134   : > { %462 = vrot.lane.b32.xlu0 %v391_v10, %s1579_s29  ;;  %460 = vrot.lane.b32.xlu1 %v390_v13, %s1579_s29 }
 0x138   : > { %595 = vrot.lane.b32.xlu0 %v563_v16, %s1579_s29  ;;  %593 = vrot.lane.b32.xlu1 %v562_v17, %s1579_s29 }
 0x13c   : > { %578 = vrot.lane.b32.xlu0 %v1826_v24, %s1574_s7  ;;  %444 = vrot.lane.b32.xlu1 %v1829_v25, %s1574_s7 }
 0x140   : > { %861 = vperm.xlu1 %1382, %v854_v19  }
 0x152   : > { %v525_v20 = vpop.permute.xlu1 %524  ;;  %v527_v21 = vpop.permute.xlu0 %526 }
 0x153   : > { %v530_v3 = vsel %vm528_vm11, %v525_v20, %v527_v21 }
 0x156   : > { %v653_v23 = vpop.permute.xlu1 %652  ;;  %v655_v26 = vpop.permute.xlu0 %654 }
 0x157   : > { %v657_v14 = vsel %vm528_vm11, %v653_v23, %v655_v26 }
 0x15a   : > { %v523_v28 = vpop.permute.xlu1 %522  ;;  %v651_v30 = vpop.permute.xlu0 %650 }
 0x15b   : > { %v529_v8 = vsel %vm528_vm11, %v523_v28, %v525_v20  ;;  %v656_v19 = vsel %vm528_vm11, %v651_v30, %v653_v23 }
 0x15e   : > { %v1992_v31 = vpop.permute.xlu1 %485  ;;  %v1994_v32 = vpop.permute.xlu0 %487 }
 0x162   : > { %v1996_v34 = vpop.permute.xlu1 %616  ;;  %v1998_v35 = vpop.permute.xlu0 %618 }
 0x166   : > { %v2000_v36 = vpop.permute.xlu1 %483  ;;  %v2002_v38 = vpop.permute.xlu0 %614 }
 0x16a   : > { %v2004_v39 = vpop.permute.xlu1 %446  ;;  %v2006_v40 = vpop.permute.xlu0 %448 }
 0x16e   : > { %v2008_v42 = vpop.permute.xlu1 %580  ;;  %v2010_v43 = vpop.permute.xlu0 %582 }
 0x172   : > { %v537_v45 = vpop.permute.xlu1 %536  ;;  %v664_v46 = vpop.permute.xlu0 %663 }
 0x176   : > { %v512_v48 = vpop.permute.xlu1 %511  ;;  %v641_v49 = vpop.permute.xlu0 %640 }
 0x17a   : > { %v498_v51 = vpop.permute.xlu1 %497  ;;  %v628_v52 = vpop.permute.xlu0 %627 }
 0x17e   : > { %v2012_v54 = vpop.permute.xlu1 %472  ;;  %v2014_v55 = vpop.permute.xlu0 %604 }
 0x182   : > { %v2016_v57 = vpop.permute.xlu1 %458  ;;  %v2018_v58 = vpop.permute.xlu0 %591 }
 0x186   : > { %v539_v60 = vpop.permute.xlu1 %538  ;;  %v541_v61 = vpop.permute.xlu0 %540 }
 0x187   : > { %v544_v63 = vsel %vm542_vm10, %v539_v60, %v541_v61  ;;  %v543_v0 = vsel %vm542_vm10, %v537_v45, %v539_v60 }
 0x188   : > { %700 = vmatprep.subr.mxu0 %v544_v63 }
 0x189   : > { %701 = vmatpush1.msra.mxu0 %v543_v0 }
 0x18a   : > { %v666_v4 = vpop.permute.xlu1 %665  ;;  %702 = vmatprep.subr.mxu0 %v530_v3  ;;  %v668_v7 = vpop.permute.xlu0 %667 }
 0x18b   : > { %703 = vmatpush1.msra.mxu0 %v529_v8  ;;  %v670_v10 = vsel %vm542_vm10, %v666_v4, %v668_v7  ;;  %v669_v13 = vsel %vm542_vm10, %v664_v46, %v666_v4  ;;  %v620_v8 = vsel %vm489_vm14, %v2002_v38, %v1996_v34 }
 0x18c   : > { %791 = vmatprep.subr.mxu1 %v670_v10 }
 0x18d   : > { %792 = vmatpush1.msra.mxu1 %v669_v13 }
 0x18e   : > { %v514_v16 = vpop.permute.xlu1 %513  ;;  %793 = vmatprep.subr.mxu1 %v657_v14  ;;  %v516_v17 = vpop.permute.xlu0 %515 }
 0x18f   : > { %794 = vmatpush1.msra.mxu1 %v656_v19  ;;  %v519_v21 = vsel %vm517_vm12, %v514_v16, %v516_v17  ;;  %v518_v20 = vsel %vm517_vm12, %v512_v48, %v514_v16  ;;  %v491_v48 = vsel %vm489_vm14, %v1992_v31, %v1994_v32  ;;  %v452_v16 = vsel %vm450_vm1, %v2004_v39, %v2006_v40 }
 0x190   : > { %704 = vmatprep.subr.mxu0 %v519_v21 }
 0x191   : > { %705 = vmatpush1.msra.mxu0 %v518_v20 }
 0x192   : > { %v643_v28 = vpop.permute.xlu1 %642  ;;  %v645_v45 = vpop.permute.xlu0 %644 }
 0x193   : > { %v647_v46 = vsel %vm517_vm12, %v643_v28, %v645_v45  ;;  %v646_v60 = vsel %vm517_vm12, %v641_v49, %v643_v28  ;;  %v490_v49 = vsel %vm489_vm14, %v2000_v36, %v1992_v31 }
 0x194   : > { %795 = vmatprep.subr.mxu1 %v647_v46  ;;  %v377_v46 = vmul.f32 %v1794_v12, %v1806_v18 }
 0x195   : > { %796 = vmatpush1.msra.mxu1 %v646_v60  ;;  %v559_v60 = vmul.f32 %v1791_v11, %v1826_v24 }
 0x196   : > { %v502_v26 = vpop.permute.xlu0 %501  ;;  %v500_v61 = vpop.permute.xlu1 %499 }
 0x197   : > { %v505_v23 = vsel %vm503_vm13, %v500_v61, %v502_v26  ;;  %v504_v30 = vsel %vm503_vm13, %v498_v51, %v500_v61  ;;  %v621_v51 = vsel %vm489_vm14, %v1996_v34, %v1998_v35 }
 0x198   : > { %706 = vmatprep.subr.mxu0 %v505_v23 }
 0x199   : > { %707 = vmatpush1.msra.mxu0 %v504_v30 }
 0x19a   : > { %v632_v63 = vpop.permute.xlu0 %631  ;;  %708 = vmatprep.subr.mxu0 %v491_v48  ;;  %v630_v0 = vpop.permute.xlu1 %629 }
 0x19b   : > { %709 = vmatpush1.msra.mxu0 %v490_v49  ;;  %v634_v3 = vsel %vm503_vm13, %v630_v0, %v632_v63  ;;  %v633_v4 = vsel %vm503_vm13, %v628_v52, %v630_v0 }
 0x19c   : > { %797 = vmatprep.subr.mxu1 %v634_v3 }
 0x19d   : > { %798 = vmatpush1.msra.mxu1 %v633_v4 }
 0x19e   : > { %v477_v32 = vpop.permute.xlu0 %476  ;;  %799 = vmatprep.subr.mxu1 %v621_v51  ;;  %v475_v7 = vpop.permute.xlu1 %474 }
 0x19f   : > { %800 = vmatpush1.msra.mxu1 %v620_v8  ;;  %v480_v31 = vsel %vm478_vm15, %v475_v7, %v477_v32  ;;  %v479_v36 = vsel %vm478_vm15, %v2012_v54, %v475_v7 }
 0x1a0   : > { %710 = vmatprep.subr.mxu0 %v480_v31 }
 0x1a1   : > { %711 = vmatpush1.msra.mxu0 %v479_v36 }
 0x1a2   : > { %v609_v52 = vpop.permute.xlu0 %608  ;;  %v607_v10 = vpop.permute.xlu1 %606 }
 0x1a3   : > { %v611_v13 = vsel %vm478_vm15, %v607_v10, %v609_v52  ;;  %v610_v35 = vsel %vm478_vm15, %v2014_v55, %v607_v10 }
 0x1a4   : > { %801 = vmatprep.subr.mxu1 %v611_v13 }
 0x1a5   : > { %802 = vmatpush1.msra.mxu1 %v610_v35 }
 0x1a6   : > { %v463_v14 = vpop.permute.xlu0 %462  ;;  %v461_v34 = vpop.permute.xlu1 %460 }
 0x1a7   : > { %v466_v38 = vsel %vm464_vm0, %v461_v34, %v463_v14  ;;  %v465_v54 = vsel %vm464_vm0, %v2016_v57, %v461_v34  ;;  %v585_v57 = vsel %vm450_vm1, %v2008_v42, %v2010_v43  ;;  %v376_v43 = vmul.f32 %v1791_v11, %v1829_v25 }
 0x1a8   : > { %712 = vmatprep.subr.mxu0 %v466_v38  ;;  %v674_v38 = vld [vmem:[%s2232_s2 + $0x8] sm:$0xff] }
 0x1a9   : > { %713 = vmatpush1.msra.mxu0 %v465_v54  ;;  %v770_v54 = vld [vmem:[#allocation7 + $0x8] sm:$0xff] }
 0x1aa   : > { %v596_v17 = vpop.permute.xlu0 %595  ;;  %714 = vmatprep.subr.mxu0 %v452_v16  ;;  %v594_v55 = vpop.permute.xlu1 %593 }
 0x1ab   : > { %v598_v19 = vsel %vm464_vm0, %v594_v55, %v596_v17  ;;  %v597_v21 = vsel %vm464_vm0, %v2018_v58, %v594_v55  ;;  %v560_v58 = vmul.f32 %v1794_v12, %v1816_v22 }
 0x1ac   : > { %803 = vmatprep.subr.mxu1 %v598_v19 }
 0x1ad   : > { %804 = vmatpush1.msra.mxu1 %v597_v21 }
 0x1ae   : > { %v579_v20 = vpop.permute.xlu0 %578  ;;  %805 = vmatprep.subr.mxu1 %v585_v57  ;;  %v445_v28 = vpop.permute.xlu1 %444 }
 0x1af   : > { %v451_v40 = vsel %vm450_vm1, %v445_v28, %v2004_v39  ;;  %v584_v45 = vsel %vm450_vm1, %v579_v20, %v2008_v42  ;;  %v673_v39 = vld [vmem:[%s2232_s2] sm:$0xff] }
 0x1b0   : > { %715 = vmatpush1.msra.mxu0 %v451_v40  ;;  %806 = vmatpush1.msra.mxu1 %v584_v45  ;;  %v769_v42 = vld [vmem:[#allocation7] sm:$0xff] }
 0x1b1   : > { %716 = vmatprep.subr.mxu0 %v377_v46  ;;  %807 = vmatprep.subr.mxu1 %v560_v58 }
 0x1b2   : > { %717 = vmatpush1.msra.mxu0 %v376_v43  ;;  %808 = vmatpush1.msra.mxu1 %v559_v60 }
 0x1b3   : > { %1259 = vmatmul.mubr.msk.f32.vlgmr.msra.gmra.mxu0 %vm676_vm2, %v673_v39  ;;  %1262 = vmatmul.mubr.msk.f32.vlgmr.msra.gmra.mxu1 %vm676_vm2, %v769_v42 }
 0x1b4   : > { %756 = vmatprep.mubr.f32.mxu0 %v1565_v1  ;;  %847 = vmatprep.mubr.f32.mxu1 %v1565_v1 }
 0x1b7   : > { %1260 = vmatmul.mubr.msk.f32.gmra.mxu0 %vm676_vm2, %v674_v38  ;;  %1263 = vmatmul.mubr.msk.f32.gmra.mxu1 %vm676_vm2, %v770_v54  ;;  %v1027_v54 = vld [vmem:[%s2234_s4] sm:$0xff] }
 0x1b8   : > { %762 = vmatprep.mubr.f32.mxu0 %v1565_v1 }
 0x1bb   : > { %v862_v18 = vpop.permute.xlu1 %861 }
 0x273   : > { %v752_v22 = vpop.f32.mrf.mxu0  ;;  %v843_v24 = vpop.f32.mrf.mxu1 }
 0x274   : > { %v857_v25 = vadd.f32 %v843_v24, %v752_v22 }
 0x275   : > { %v754_v26 = vpop.f32.mrf.mxu0  ;;  %v845_v61 = vpop.f32.mrf.mxu1 }
 0x276   : > { %v858_v23 = vadd.f32 %v845_v61, %v754_v26  ;;  %v864_v30 = vadd.f32 %v862_v18, %v857_v25 }
 0x278   : > { %v865_v48 = vadd.f32 %v862_v18, %v858_v23  ;;  %v1264_v63 = vmul.f32 -1.442695, %v864_v30 }
 0x27a   : > { %1384 = vpow2.f32 %v1264_v63  ;;  %v1265_v0 = vmul.f32 -1.442695, %v865_v48 }
 0x27c   : > { %1386 = vpow2.f32 %v1265_v0 }
 0x287   : > { %v1385_v49 = vpop.eup %1384 }
 0x288   : > { %v872_v3 = vadd.f32 1.0, %v1385_v49 }
 0x289   : > { %v1387_v4 = vpop.eup %1386 }
 0x28a   : > { %v873_v51 = vadd.f32 1.0, %v1387_v4  ;;  %1388 = vrcp.f32 %v872_v3 }
 0x28c   : > { %1390 = vrcp.f32 %v873_v51 }
 0x297   : > { %v1389_v32 = vpop.eup %1388 }
 0x298   : > { %v899_v7 = vmul.f32 %v1389_v32, %v1783_v6 }
 0x299   : > { %v1391_v8 = vpop.eup %1390 }
 0x29a   : > { %903 = vrot.lane.b32.xlu0 %v899_v7, %s1566_s27  ;;  %v900_v31 = vmul.f32 %v1391_v8, %v1801_v15 }
 0x29c   : > { %905 = vrot.lane.b32.xlu1 %v900_v31, %s1566_s27  ;;  %s1124_s27 = scalar_lea.sflag [#allocation4], %s1758_s3 }
 0x30c   : > { %v904_v36 = vpop.permute.xlu0 %903 }
 0x30d   : > { %v2090_v52 = vsel %vm369_vm4, 0.0, %v904_v36 }
 0x30e   : > { %v906_v10 = vpop.permute.xlu1 %905  ;;  %968 = vrot.lane.b32.xlu0 %v2090_v52, %s1573_s26  ;;  %1004 = vrot.lane.b32.xlu1 %v2090_v52, %s1572_s14  ;;  %v927_v13 = vmul.f32 %v1851_v27, %v2090_v52  ;;  %v921_v14 = vmul.f32 %v1865_v33, %v2090_v52  ;;  %v924_v27 = vmul.f32 %v1857_v29, %v2090_v52 }
 0x30f   : > { %v2099_v35 = vsel %vm369_vm4, %v904_v36, %v906_v10  ;;  %v912_v34 = vsel %vm369_vm4, %v906_v10, 0.0  ;;  %v918_v33 = vmul.f32 %v1873_v37, %v2090_v52  ;;  %v915_v29 = vmul.f32 %v1881_v41, %v2090_v52  ;;  %v675_v41 = vld [vmem:[%s2232_s2 + $0x10] sm:$0xff] }
 0x310   : > { %v929_v37 = vmul.f32 %v1887_v44, %v912_v34  ;;  %v928_v16 = vmul.f32 %v2099_v35, %v1897_v47  ;;  %v926_v17 = vmul.f32 %v1905_v50, %v912_v34  ;;  %v925_v55 = vmul.f32 %v2099_v35, %v1915_v53  ;;  %1261 = vmatmul.mubr.msk.f32.gmra.mxu0 %vm676_vm2, %v675_v41 }
 0x311   : > { %v923_v44 = vmul.f32 %v1923_v56, %v912_v34  ;;  %v922_v47 = vmul.f32 %v2099_v35, %v1933_v59  ;;  %1095 = vmatprep.mubr.f32.mxu0 %v1565_v1  ;;  %v920_v50 = vmul.f32 %v1941_v62, %v912_v34  ;;  %v919_v53 = vmul.f32 %v2099_v35, %v1951_v2  ;;  %v856_v1 = vld [vmem:[%s2235_s5 + $0x10] sm:$0xff]  ;;  %v855_v62 = vld [vmem:[%s2235_s5 + $0x8] sm:$0xff] }
 0x312   : > { %1017 = vrot.lane.b32.xlu0 %v927_v13, %s1575_s11  ;;  %1006 = vrot.lane.b32.xlu1 %v2099_v35, %s1572_s14  ;;  %v917_v56 = vmul.f32 %v1959_v5, %v912_v34  ;;  %v916_v59 = vmul.f32 %v2099_v35, %v1969_v9  ;;  %v913_v38 = vmul.f32 %v1791_v11, %v2090_v52 }
 0x316   : > { %1008 = vrot.lane.b32.xlu0 %v912_v34, %s1572_s14  ;;  %981 = vrot.lane.b32.xlu1 %v921_v14, %s1577_s8 }
 0x31a   : > { %994 = vrot.lane.b32.xlu0 %v924_v27, %s1576_s16  ;;  %972 = vrot.lane.b32.xlu1 %v912_v34, %s1573_s26  ;;  %v914_v27 = vmul.f32 %v1794_v12, %v2099_v35 }
 0x31e   : > { %970 = vrot.lane.b32.xlu0 %v2099_v35, %s1573_s26  ;;  %958 = vrot.lane.b32.xlu1 %v918_v33, %s1578_s10  ;;  %v758_v33 = vpop.f32.mrf.mxu0 }
 0x322   : > { %945 = vrot.lane.b32.xlu0 %v915_v29, %s1579_s29  ;;  %934 = vrot.lane.b32.xlu1 %v2099_v35, %s1574_s7  ;;  %v849_v29 = vpop.f32.mrf.mxu1 }
 0x326   : > { %1021 = vrot.lane.b32.xlu1 %v929_v37, %s1575_s11  ;;  %1019 = vrot.lane.b32.xlu0 %v928_v16, %s1575_s11  ;;  %v878_v37 = vadd.f32 %v849_v29, %v758_v33 }
 0x32a   : > { %998 = vrot.lane.b32.xlu1 %v926_v17, %s1576_s16  ;;  %996 = vrot.lane.b32.xlu0 %v925_v55, %s1576_s16  ;;  %v760_v17 = vpop.f32.mrf.mxu0  ;;  %v851_v55 = vpop.f32.mrf.mxu1 }
 0x32b   : > { %v879_v41 = vadd.f32 %v851_v55, %v760_v17 }
 0x32e   : > { %985 = vrot.lane.b32.xlu0 %v923_v44, %s1577_s8  ;;  %983 = vrot.lane.b32.xlu1 %v922_v47, %s1577_s8 }
 0x332   : > { %962 = vrot.lane.b32.xlu0 %v920_v50, %s1578_s10  ;;  %960 = vrot.lane.b32.xlu1 %v919_v53, %s1578_s10  ;;  %s1276_s10 = sshll.u32 %s1638_s25, 8  ;;  %s1581_s25 = smov [#allocation8]  }
 0x333   : > { %s1136_s30 = scalar_lea.hbm %s2236_s6, %s1276_s10 }
 0x336   : > { %949 = vrot.lane.b32.xlu1 %v917_v56, %s1579_s29  ;;  %947 = vrot.lane.b32.xlu0 %v916_v59, %s1579_s29  ;;  %s319_s29 = scalar_lea.vmem [#allocation8], %s1761_s23  ;;  %s1490_s23 = sshll.u32 %s1581_s25, 4  ;;  %s1491_s23 = int_to_ptr.vmem [resolvable:$false] %s1490_s23 }
 0x337   : > { %s1138_s12 = sshll.u32 %s319_s29, 4  ;;  %s1492_s20 = scalar_lea.vmem %s1491_s23, 512  ;;  %s1139_s12 = int_to_ptr.vmem [resolvable:$true] %s1138_s12 }
 0x338   : > { %s1486_s19 = scalar_lea.vmem %s1139_s12, 256  ;;  %p1493_p13 = scmp.lt.s32.totalorder %s1139_s12, %s1491_s23 }
 0x339   : > { %p1487_p3 = scmp.ne.s32.totalorder %s1139_s12, %s1486_s19  ;;  %p1494_p0 = scmp.lt.s32.totalorder %s1492_s20, %s1486_s19 }
 0x33a   : > { %932 = vrot.lane.b32.xlu1 %v2090_v52, %s1574_s7  ;;  %936 = vrot.lane.b32.xlu0 %v912_v34, %s1574_s7 }
 0x33b   : > { %p1488_p10 = pnand %p1487_p3, %p2257_p12  ;;  %p1495_p5 = por %p1494_p0, %p1493_p13 }
 0x33d   : > { %p1489_p2 = pneg %p1488_p10 }
 0x33e   : > { %1106 = vperm.xlu1 %1382, %v856_v1   ;;  %882 = vperm.xlu0 %1383, %v855_v62  }
 0x33f   : > { %p1496_p9 = pnand %p1495_p5, %p1489_p2 }
 0x380   : > { %v969_v2 = vpop.permute.xlu0 %968  ;;  %v1005_v5 = vpop.permute.xlu1 %1004 }
 0x384   : > { %v1018_v9 = vpop.permute.xlu0 %1017  ;;  %v1007_v19 = vpop.permute.xlu1 %1006 }
 0x385   : > { %v1010_v22 = vsel %vm528_vm11, %v1005_v5, %v1007_v19 }
 0x388   : > { %v1009_v21 = vpop.permute.xlu0 %1008  ;;  %v982_v57 = vpop.permute.xlu1 %981 }
 0x389   : > { %v1011_v18 = vsel %vm528_vm11, %v1007_v19, %v1009_v21 }
 0x38c   : > { %v995_v20 = vpop.permute.xlu0 %994  ;;  %v973_v28 = vpop.permute.xlu1 %972 }
 0x390   : > { %v971_v40 = vpop.permute.xlu0 %970  ;;  %v959_v45 = vpop.permute.xlu1 %958 }
 0x391   : > { %v975_v0 = vsel %vm489_vm14, %v971_v40, %v973_v28  ;;  %v974_v49 = vsel %vm489_vm14, %v969_v2, %v971_v40 }
 0x394   : > { %v946_v46 = vpop.permute.xlu0 %945  ;;  %v935_v58 = vpop.permute.xlu1 %934 }
 0x398   : > { %v1022_v43 = vpop.permute.xlu1 %1021  ;;  %v1020_v60 = vpop.permute.xlu0 %1019 }
 0x399   : > { %v1023_v39 = vsel %vm542_vm10, %v1018_v9, %v1020_v60  ;;  %v1024_v42 = vsel %vm542_vm10, %v1020_v60, %v1022_v43 }
 0x39a   : > { %1045 = vmatprep.subr.mxu0 %v1024_v42 }
 0x39b   : > { %1046 = vmatpush1.msra.mxu0 %v1023_v39 }
 0x39c   : > { %v999_v24 = vpop.permute.xlu1 %998  ;;  %1047 = vmatprep.subr.mxu0 %v1011_v18  ;;  %v997_v25 = vpop.permute.xlu0 %996 }
 0x39d   : > { %v1000_v26 = vsel %vm517_vm12, %v995_v20, %v997_v25  ;;  %1048 = vmatpush1.msra.mxu0 %v1010_v22  ;;  %v1001_v61 = vsel %vm517_vm12, %v997_v25, %v999_v24 }
 0x39e   : > { %1049 = vmatprep.subr.mxu0 %v1001_v61 }
 0x39f   : > { %1050 = vmatpush1.msra.mxu0 %v1000_v26 }
 0x3a0   : > { %v986_v23 = vpop.permute.xlu0 %985  ;;  %v984_v30 = vpop.permute.xlu1 %983 }
 0x3a1   : > { %v987_v48 = vsel %vm503_vm13, %v982_v57, %v984_v30  ;;  %v988_v63 = vsel %vm503_vm13, %v984_v30, %v986_v23 }
 0x3a2   : > { %1051 = vmatprep.subr.mxu0 %v988_v63 }
 0x3a3   : > { %1052 = vmatpush1.msra.mxu0 %v987_v48 }
 0x3a4   : > { %v963_v3 = vpop.permute.xlu0 %962  ;;  %1053 = vmatprep.subr.mxu0 %v975_v0  ;;  %v961_v4 = vpop.permute.xlu1 %960 }
 0x3a5   : > { %v964_v51 = vsel %vm478_vm15, %v959_v45, %v961_v4  ;;  %1054 = vmatpush1.msra.mxu0 %v974_v49  ;;  %v965_v32 = vsel %vm478_vm15, %v961_v4, %v963_v3 }
 0x3a6   : > { %1055 = vmatprep.subr.mxu0 %v965_v32 }
 0x3a7   : > { %1056 = vmatpush1.msra.mxu0 %v964_v51 }
 0x3a8   : > { %v950_v7 = vpop.permute.xlu1 %949  ;;  %v948_v8 = vpop.permute.xlu0 %947 }
 0x3a9   : > { %v951_v31 = vsel %vm464_vm0, %v946_v46, %v948_v8  ;;  %v952_v36 = vsel %vm464_vm0, %v948_v8, %v950_v7 }
 0x3aa   : > { %1057 = vmatprep.subr.mxu0 %v952_v36 }
 0x3ab   : > { %1058 = vmatpush1.msra.mxu0 %v951_v31 }
 0x3ac   : > { %v933_v10 = vpop.permute.xlu1 %932  ;;  %v937_v13 = vpop.permute.xlu0 %936 }
 0x3ad   : > { %v938_v14 = vsel %vm450_vm1, %v933_v10, %v935_v58  ;;  %v939_v34 = vsel %vm450_vm1, %v935_v58, %v937_v13 }
 0x3ae   : > { %1059 = vmatprep.subr.mxu0 %v939_v34 }
 0x3af   : > { %1060 = vmatpush1.msra.mxu0 %v938_v14 }
 0x3b0   : > { %1061 = vmatprep.subr.mxu0 %v914_v27 }
 0x3b1   : > { %1062 = vmatpush1.msra.mxu0 %v913_v38 }
 0x3b2   : > { %1268 = vmatmul.mubr.msk.f32.vlgmr.msra.gmra.mxu0 %vm676_vm2, %v1027_v54 }
 0x3b9   : > { %v883_v16 = vpop.permute.xlu0 %882  ;;  %v1107_v2 = vpop.permute.xlu1 %1106 }
 0x3ba   : > { %v885_v12 = vadd.f32 %v883_v16, %v878_v37  ;;  %v886_v35 = vadd.f32 %v883_v16, %v879_v41 }
 0x3bc   : > { %v1266_v44 = vmul.f32 -1.442695, %v885_v12  ;;  %v1267_v11 = vmul.f32 -1.442695, %v886_v35 }
 0x3be   : > { %1392 = vpow2.f32 %v1266_v44 }
 0x3bf   : > { %1394 = vpow2.f32 %v1267_v11 }
 0x3cb   : > { %v1393_v52 = vpop.eup %1392 }
 0x3cc   : > { %v893_v47 = vadd.f32 1.0, %v1393_v52  ;;  %v1395_v50 = vpop.eup %1394 }
 0x3cd   : > { %v894_v56 = vadd.f32 1.0, %v1395_v50 }
 0x3ce   : > { %1396 = vrcp.f32 %v893_v47 }
 0x3cf   : > { %1398 = vrcp.f32 %v894_v56 }
 0x3d0   : > { %v764_v53 = vpop.f32.mrf.mxu0 }
 0x3d2   : > { %v766_v59 = vpop.f32.mrf.mxu0 }
 0x3db   : > { %v1397_v57 = vpop.eup %1396 }
 0x3dc   : > { %v1113_v20 = vsub.f32 1.0, %v1397_v57  ;;  %v1399_v28 = vpop.eup %1398 }
 0x3dd   : > { %v1114_v40 = vsub.f32 1.0, %v1399_v28 }
 0x3de   : > { %v1115_v45 = vmul.f32 %v1113_v20, %v1783_v6 }
 0x3df   : > { %v1116_v60 = vmul.f32 %v1114_v40, %v1801_v15 }
 0x472   : > { %v1097_v1 = vpop.f32.mrf.mxu0 }
 0x473   : > { %v1102_v62 = vadd.f32 %v1097_v1, %v764_v53 }
 0x474   : > { %v1099_v5 = vpop.f32.mrf.mxu0 }
 0x475   : > { %v1109_v9 = vadd.f32 %v1107_v2, %v1102_v62  ;;  %v1103_v19 = vadd.f32 %v1099_v5, %v766_v59 }
 0x477   : > { %1400 = vtanh.f32 %v1109_v9  ;;  %v1110_v21 = vadd.f32 %v1107_v2, %v1103_v19 }
 0x479   : > { %1402 = vtanh.f32 %v1110_v21 }
 0x484   : > { %v1401_v46 = vpop.eup %1400 }
 0x485   : > { %v1117_v58 = vmul.f32 %v1401_v46, %v1397_v57 }
 0x486   : > { %v1403_v43 = vpop.eup %1402 }
 0x487   : > { %v1118_v39 = vmul.f32 %v1403_v43, %v1399_v28  ;;  %v1119_v42 = vadd.f32 %v1117_v58, %v1115_v45 }
 0x489   : > { %v1120_v18 = vadd.f32 %v1118_v39, %v1116_v60  ;;  %1121 = vst [vmem:[%s319_s29] sm:$0xff] %v1119_v42 }
 0x48b   : > { %1122 = vst [vmem:[%s319_s29 + $0x8] sm:$0xff] %v1120_v18 }
 0x48c   : > { %1499 = shalt.err (!%p1496_p9)
}
 0x48d   : > { %s1500_s13 = scalar_lea.hbm %s1136_s30, 256  ;;  %s1504_s26 = scalar_lea.hbm %s2236_s6, 512 }
 0x48e   : > { %p1501_p1 = scmp.ne.s32.totalorder %s1136_s30, %s1500_s13  ;;  %p1505_p7 = scmp.lt.s32.totalorder %s1136_s30, %s2236_s6 }
 0x48f   : > { %p1506_p11 = scmp.lt.s32.totalorder %s1504_s26, %s1500_s13 }
 0x490   : > { %p1502_p4 = pnand %p1501_p1, %p2257_p12 }
 0x491   : > { %p1507_p8 = por %p1506_p11, %p1505_p7 }
 0x492   : > { %p1503_p6 = pneg %p1502_p4 }
 0x494   : > { %p1508_p3 = pnand %p1507_p8, %p1503_p6 }
 0x496   : > { %1511 = shalt.err (!%p1508_p3)
}
 0x497   : > { %1285 = dma.vmem_to_hbm [thread:$0]  (%p2257_p12), %s1139_s12, 256, %s1136_s30, %s1124_s27  }
 0x498 PF: > { %s1150_s7 = sand.u32 1, %s1546_s21   ;;  %p2258_p10 = scmp.ne.s32.totalorder %s2245_s28, 0 }
 0x499   : > { %p2259_p2 = scmp.ge.s32.totalorder %s1558_s24, 2  ;;  %s1151_s8 = scalar_lea.sflag [#allocation4], %s1150_s7 }
 0x49b   : > { %p1299_p13 = pnand %p2259_p2, %p2258_p10 }
 0x49d   : > { %p1300_p0 = pneg %p1299_p13 }
 0x49f   : > { %1541 = dma.done.wait (%p1300_p0), %s1151_s8, 256  }
 0x4a0   : > { %1543 = vsyncadd (%p1300_p0), %s1151_s8, 4294967040  ;;  %s2260_s10 = sld [smem:[#allocation13_spill]]  ;;  %p22_p5 = scmp.ge.s32.totalorder %s1671_s9, 4  }
 0x4a1   : > { %s2261_s23 = sld [smem:[#allocation14_spill]]  ;;  %s2262_s21 = smov %s1550_s22 }
 0x4a2   : > { %s2264_s24 = smov %s1671_s9  ;;  %24 = sbr.rel (!%p22_p5) target bundleno = 9 (0x9), region = 106 }
 0x4a6   : > { %s2263_s22 = smov %s2260_s10 }
 0x4a7   :  { %1156 = vsyncpa [#allocation3], 1 }
 0x4a8   :  { %1158 = vsyncpa [#allocation3 + $0x1], 1 }
 0x4a9   :  { %1159 = vsyncpa [#allocation6], 1 }
 0x4aa   :  { %1161 = vsyncpa [#allocation6 + $0x1], 1 }
 0x4ab   :  { %1162 = vsyncpa [#allocation4], 1 }
 0x4ac   :  { %1164 = vsyncpa [#allocation4 + $0x1], 1 }

</bundles_post_ra>
